<compile_context>
chip_gen: v7x
topology: tpu7x:2x2x1
jax: 0.10.0
libtpu: 0.0.40
codegen_flags: <defaults>
</compile_context>

<pallas_src>
from functools import partial

import jax
import jax.numpy as jnp
from jax import lax
from jax.experimental import pallas as pl
from jax.experimental.pallas import tpu as pltpu


def _node2vec_kernel(idx_ref, x_hbm_ref, loss_ref,
                     x_vmem, copy_sem, m_scr, d_scr,
                     *, n_pos, n_cols, n_nodes, b_tile, b_valid):
    """One grid step scores a tile of `b_tile` walks.

    idx_ref   : VMEM (b_tile, K+1) int32  per-tile indices; column 0 = start node
    x_hbm_ref : ANY  (N, D)               embedding table, left in HBM
    loss_ref  : VMEM (B_pad, 1)           full output block, resident across the grid
    x_vmem    : VMEM (N, D)               single-buffered resident table copy
    copy_sem  : DMA semaphore             for the one-time table copy
    m_scr     : VMEM (1, K) f32           running per-column max
    d_scr     : VMEM (1, K) f32           running per-column sum-exp
    """
    t = pl.program_id(0)
    nt = pl.num_programs(0)
    base = pl.multiple_of(t * b_tile, 8)
    K = n_cols

    # ---- one-time init: copy the table into VMEM (single buffer, no pipeline
    #      double-buffering) and reset the online-softmax statistics.
    @pl.when(t == 0)
    def _init():
        cp = pltpu.make_async_copy(x_hbm_ref, x_vmem, copy_sem)
        cp.start()
        cp.wait()
        m_scr[...] = jnp.full_like(m_scr, -1e30)
        d_scr[...] = jnp.zeros_like(d_scr)

    table = x_vmem[...]                                   # (N, D), native dtype
    idx_blk = idx_ref[...]                                # (b_tile, K+1) int32
    iota_n = lax.broadcasted_iota(jnp.int32, (b_tile, n_nodes), 1)
    one = jnp.array(1, dtype=table.dtype)
    zero = jnp.array(0, dtype=table.dtype)

    def gather_col(k):
        # Vectorized one-hot MXU gather of a whole column of rows:
        #   (b_tile, N) one-hot  @  (N, D) table  ->  (b_tile, D) f32.
        onehot = jnp.where(idx_blk[:, k:k + 1] == iota_n, one, zero)
        return jnp.dot(onehot, table, preferred_element_type=jnp.float32)

    e_s = gather_col(0)                                   # start-node embeddings

    # ---- scores, column by column (K small & static -> fully unrolled); the
    #      (b_tile, K, D) product is never materialized.
    cols = []
    rowpos = jnp.zeros((b_tile, 1), jnp.float32)
    for k in range(K):
        wn_k = gather_col(k + 1)                          # (b_tile, D) f32
        sc_k = jnp.sum(wn_k * e_s, axis=-1, keepdims=True)
        cols.append(sc_k)
        if k < n_pos:                                     # positives are first
            rowpos = rowpos + sc_k
    scores = jnp.concatenate(cols, axis=1)                # (b_tile, K)

    # ---- online softmax over the *batch* axis (dim 0), per column ----------
    rows = base + lax.broadcasted_iota(jnp.int32, (b_tile, 1), 0)
    valid = rows < b_valid                                # mask padded walks
    masked = jnp.where(valid, scores, -1e30)
    m_old = m_scr[...]
    m_new = jnp.maximum(m_old, jnp.max(masked, axis=0, keepdims=True))
    p = jnp.where(valid, jnp.exp(masked - m_new), 0.0)
    d_scr[...] = d_scr[...] * jnp.exp(m_old - m_new) + jnp.sum(p, axis=0, keepdims=True)
    m_scr[...] = m_new

    # partial loss for this tile: sum of positive-column scores per walk
    loss_ref[pl.ds(base, b_tile), :] = rowpos

    # ---- finalize on the last tile:
    #      loss[b] = sum_{k<n_pos} lse_k - sum_{k<n_pos} scores[b,k]
    @pl.when(t == nt - 1)
    def _finalize():
        lse_pos = m_scr[:, :n_pos] + jnp.log(d_scr[:, :n_pos])    # (1, n_pos)
        c = jnp.sum(lse_pos)
        loss_ref[...] = c - loss_ref[...]


def _round_up(x, m):
    return (x + m - 1) // m * m


def _vmem_capacity_bytes(default=64 * 1024 * 1024):
    """Physical VMEM of the attached TPU; conservative (v7x-sized) default if unknown."""
    try:
        cap = getattr(pltpu.get_tpu_info(), "vmem_capacity_bytes", None)
        if cap:
            return int(cap)
    except Exception:
        pass
    return default


def node2vec_forward(X, s, w, neg, *, n_pos=5, b_tile=512, score_negatives=True):
    """node2vec forward.  X: (N, D) f32/bf16; s: (B,); w: (B, L-1); neg: (B, n_neg)."""
    s = s.astype(jnp.int32)
    w = w.astype(jnp.int32)
    neg = neg.astype(jnp.int32)
    if score_negatives:
        # Faithful to the module's data flow: gather & score all of cat(w, neg).
        idx = jnp.concatenate([s[:, None], w, neg], axis=1)       # (B, K+1), col 0 = s
    else:
        # Columns >= n_pos never reach the loss (per-column softmax over the batch).
        assert n_pos <= w.shape[1]
        idx = jnp.concatenate([s[:, None], w], axis=1)
    B, K1 = idx.shape
    K = K1 - 1
    N, D = X.shape
    itemsize = jnp.dtype(X.dtype).itemsize

    # VMEM budget: ~80% of physical, capped at 100 MiB (v5e/v6e: 128 MiB physical ->
    # 100 MiB; v7x: 64 MiB physical -> ~51 MiB).  Gate the resident-table fast path.
    vmem_limit = max(32 * 1024 * 1024,
                     min(int(0.8 * _vmem_capacity_bytes()), 100 * 1024 * 1024))
    if N * D * itemsize > (3 * vmem_limit) // 4:
        # TODO(synk): batched, double-buffered HBM row-DMA gather path for huge tables.
        raise NotImplementedError("embedding table too large for the VMEM-resident fast path")

    b_tile = max(8, min(_round_up(b_tile, 8), _round_up(B, 8)))
    b_pad = _round_up(B, b_tile)
    nt = b_pad // b_tile
    pad = b_pad - B
    if pad:
        idx = jnp.concatenate([idx, jnp.zeros((pad, K1), jnp.int32)], axis=0)

    kernel = partial(_node2vec_kernel, n_pos=n_pos, n_cols=K, n_nodes=N,
                     b_tile=b_tile, b_valid=B)

    grid_spec = pltpu.PrefetchScalarGridSpec(
        num_scalar_prefetch=0,
        grid=(nt,),
        in_specs=[
            # Per-tile index block in VMEM (replaces whole-batch SMEM scalar prefetch).
            pl.BlockSpec((b_tile, K1), lambda t: (t, 0)),
            # Table stays in HBM; copied once into a single VMEM scratch at t == 0.
            pl.BlockSpec(memory_space=pl.ANY),
        ],
        # Full output block, resident across the grid; written back once at the end.
        out_specs=pl.BlockSpec((b_pad, 1), lambda t: (0, 0)),
        scratch_shapes=[
            pltpu.VMEM((N, D), X.dtype),          # single-buffered resident table
            pltpu.SemaphoreType.DMA(()),          # one-time table copy
            pltpu.VMEM((1, K), jnp.float32),      # running per-column max
            pltpu.VMEM((1, K), jnp.float32),      # running per-column sum-exp
        ],
    )

    cost = pl.CostEstimate(
        flops=2 * b_pad * (K + 1) * N * D + 3 * b_pad * K * D,
        transcendentals=b_pad * K + n_pos,
        bytes_accessed=N * D * itemsize + 4 * b_pad * (K1 + 1),
    )

    out = pl.pallas_call(
        kernel,
        out_shape=jax.ShapeDtypeStruct((b_pad, 1), jnp.float32),
        grid_spec=grid_spec,
        compiler_params=pltpu.CompilerParams(
            # the online softmax over the batch axis couples the tiles -> sequential
            dimension_semantics=("arbitrary",),
            vmem_limit_bytes=vmem_limit,
        ),
        cost_estimate=cost,
    )(idx, X)
    return out[:B, 0]                                          # (B,)


def node2vec_reference(X, s, w, neg, n_pos=5):
    idx = jnp.concatenate([w, neg], axis=1)
    temp = X[idx]                                      # (B, K, D)
    temp = jnp.einsum("bkd,bd->bk", temp, X[s])        # (B, K)
    temp = jax.nn.softmax(temp, axis=0)                # softmax over dim 0, as in the module
    temp = jnp.log(temp[:, :n_pos])
    return -jnp.sum(temp, axis=1)


if __name__ == "__main__":
    key = jax.random.PRNGKey(0)
    N = 32          # input_dim (number of nodes in the graph)
    D = 128         # embedding dim (fixed to 128 in the module)
    B = 20          # number of walks; deliberately not a multiple of 8 -> exercises padding
    walk_rest = 5   # len(w) per walk (module uses temp[:, :5])
    n_neg = 5       # negative samples per walk

    k_x, k_s, k_w, k_n = jax.random.split(key, 4)
    # kaiming_normal_ on a (N, 128) tensor: fan_in = 128, gain = sqrt(2)
    X = jax.random.normal(k_x, (N, D), dtype=jnp.float32) * jnp.sqrt(2.0 / D)
    s = jax.random.randint(k_s, (B,), 0, N, dtype=jnp.int32)
    w = jax.random.randint(k_w, (B, walk_rest), 0, N, dtype=jnp.int32)
    neg = jax.random.randint(k_n, (B, n_neg), 0, N, dtype=jnp.int32)

    ref = node2vec_reference(X, s, w, neg)

    # f32 table, tiny tile -> multi-tile grid (nt = 3) exercises the cross-tile softmax.
    # Tolerances allow for the MXU-based one-hot gather on f32 tables.
    loss = node2vec_forward(X, s, w, neg, b_tile=8)
    jax.block_until_ready(loss)
    assert loss.shape == (B,)
    assert jnp.allclose(loss, ref, atol=1e-3, rtol=1e-3), (loss, ref)

    # Fast path: skip the negative columns (they provably never reach the loss).
    loss_fast = node2vec_forward(X, s, w, neg, score_negatives=False)
    jax.block_until_ready(loss_fast)
    assert jnp.allclose(loss_fast, ref, atol=1e-3, rtol=1e-3), (loss_fast, ref)

    # bf16 table storage (halves table DMA / VMEM); gather accumulates in f32.
    X_bf = X.astype(jnp.bfloat16)
    loss_bf = node2vec_forward(X_bf, s, w, neg)
    jax.block_until_ready(loss_bf)
    ref_bf = node2vec_reference(X_bf.astype(jnp.float32), s, w, neg)
    assert jnp.allclose(loss_bf, ref_bf, atol=1e-3, rtol=1e-3), (loss_bf, ref_bf)

    print("KERNEL_OK")
</pallas_src>

<mosaic_0001>
module attributes {stable_mosaic.version = 11 : i64} {
  func.func @_node2vec_kernel(%arg0: i32, %arg1: memref<8x11xi32, #tpu.memory_space<vmem>>, %arg2: memref<32x128xf32, #tpu.memory_space<any>>, %arg3: memref<24x1xf32, #tpu.memory_space<vmem>>, %arg4: memref<32x128xf32, #tpu.memory_space<vmem>>, %arg5: memref<!tpu.dma_semaphore, #tpu.memory_space<semaphore_mem>>, %arg6: memref<1x10xf32, #tpu.memory_space<vmem>>, %arg7: memref<1x10xf32, #tpu.memory_space<vmem>>) attributes {dimension_semantics = [#tpu.dimension_semantics<arbitrary>], iteration_bounds = array<i64: 3>, scalar_prefetch = 0 : i64, scratch_operands = 4 : i64, tpu.core_type = #tpu.core_type<tc>, window_params = [{transform_indices = @transform_0, window_bounds = array<i64: 8, 11>}, {}, {pipeline_mode = #tpu.pipeline_mode<synchronous>, transform_indices = @transform_2, window_bounds = array<i64: 24, 1>}]} {
    %c8_i32 = arith.constant 8 : i32
    %0 = arith.muli %arg0, %c8_i32 : i32
    %1 = tpu.assume_multiple %0, 8 : i32
    %c0_i32 = arith.constant 0 : i32
    %2 = arith.cmpi eq, %arg0, %c0_i32 : i32
    %3 = arith.extui %2 : i1 to i32
    %c0_i32_0 = arith.constant 0 : i32
    %4 = arith.cmpi ne, %3, %c0_i32_0 : i32
    scf.if %4 {
      tpu.enqueue_dma source(%arg2 : memref<32x128xf32, #tpu.memory_space<any>>) target(%arg4 : memref<32x128xf32, #tpu.memory_space<vmem>>) target_semaphore(%arg5 : memref<!tpu.dma_semaphore, #tpu.memory_space<semaphore_mem>>)
      tpu.wait_dma2 semaphore(%arg5 : memref<!tpu.dma_semaphore, #tpu.memory_space<semaphore_mem>>) src(%arg2 : memref<32x128xf32, #tpu.memory_space<any>>) dst(%arg4 : memref<32x128xf32, #tpu.memory_space<vmem>>)
      %cst_61 = arith.constant -1.000000e+30 : f32
      %156 = vector.broadcast %cst_61 : f32 to vector<1x10xf32>
      %c0_62 = arith.constant 0 : index
      %c0_63 = arith.constant 0 : index
      %157 = vector.load %arg6[%c0_62, %c0_63] : memref<1x10xf32, #tpu.memory_space<vmem>>, vector<1x10xf32>
      tpu.vector_store %arg6[%c0_62, %c0_63], %156 {strides = array<i32>} : memref<1x10xf32, #tpu.memory_space<vmem>>, vector<1x10xf32>,
      %cst_64 = arith.constant 0.000000e+00 : f32
      %158 = vector.broadcast %cst_64 : f32 to vector<1x10xf32>
      %c0_65 = arith.constant 0 : index
      %c0_66 = arith.constant 0 : index
      %159 = vector.load %arg7[%c0_65, %c0_66] : memref<1x10xf32, #tpu.memory_space<vmem>>, vector<1x10xf32>
      tpu.vector_store %arg7[%c0_65, %c0_66], %158 {strides = array<i32>} : memref<1x10xf32, #tpu.memory_space<vmem>>, vector<1x10xf32>,
    } else {
    }
    %c0 = arith.constant 0 : index
    %c0_1 = arith.constant 0 : index
    %5 = vector.load %arg4[%c0, %c0_1] : memref<32x128xf32, #tpu.memory_space<vmem>>, vector<32x128xf32>
    %c0_2 = arith.constant 0 : index
    %c0_3 = arith.constant 0 : index
    %6 = vector.load %arg1[%c0_2, %c0_3] : memref<8x11xi32, #tpu.memory_space<vmem>>, vector<8x11xi32>
    %7 = tpu.iota {dimensions = array<i32: 1>} : vector<8x32xi32>
    %8 = vector.extract_strided_slice %6 {offsets = [0, 0], sizes = [8, 1], strides = [1, 1]} : vector<8x11xi32> to vector<8x1xi32>
    %9 = vector.broadcast %8 : vector<8x1xi32> to vector<8x32xi32>
    %10 = arith.cmpi eq, %9, %7 : vector<8x32xi32>
    %cst = arith.constant 1.000000e+00 : f32
    %cst_4 = arith.constant 0.000000e+00 : f32
    %11 = vector.broadcast %cst : f32 to vector<8x32xf32>
    %12 = vector.broadcast %cst_4 : f32 to vector<8x32xf32>
    %13 = arith.select %10, %11, %12 : vector<8x32xi1>, vector<8x32xf32>
    %cst_5 = arith.constant dense<0.000000e+00> : vector<8x128xf32>
    %14 = tpu.matmul %13, %5, %cst_5 {dimension_numbers = #tpu.dot_dimension_numbers<[1], [0], [0], [1], [0, 0, 1, 1], [], []>} : vector<8x32xf32>, vector<32x128xf32>, vector<8x128xf32> -> vector<8x128xf32>
    %cst_6 = arith.constant 0.000000e+00 : f32
    %15 = vector.broadcast %cst_6 : f32 to vector<8x1xf32>
    %16 = vector.extract_strided_slice %6 {offsets = [0, 1], sizes = [8, 1], strides = [1, 1]} : vector<8x11xi32> to vector<8x1xi32>
    %17 = vector.broadcast %16 : vector<8x1xi32> to vector<8x32xi32>
    %18 = arith.cmpi eq, %17, %7 : vector<8x32xi32>
    %cst_7 = arith.constant 1.000000e+00 : f32
    %cst_8 = arith.constant 0.000000e+00 : f32
    %19 = vector.broadcast %cst_7 : f32 to vector<8x32xf32>
    %20 = vector.broadcast %cst_8 : f32 to vector<8x32xf32>
    %21 = arith.select %18, %19, %20 : vector<8x32xi1>, vector<8x32xf32>
    %cst_9 = arith.constant dense<0.000000e+00> : vector<8x128xf32>
    %22 = tpu.matmul %21, %5, %cst_9 {dimension_numbers = #tpu.dot_dimension_numbers<[1], [0], [0], [1], [0, 0, 1, 1], [], []>} : vector<8x32xf32>, vector<32x128xf32>, vector<8x128xf32> -> vector<8x128xf32>
    %23 = arith.mulf %22, %14 : vector<8x128xf32>
    %cst_10 = arith.constant dense<0.000000e+00> : vector<8xf32>
    %24 = vector.multi_reduction <add>, %23, %cst_10 [1] : vector<8x128xf32> to vector<8xf32>
    %25 = vector.shape_cast %24 : vector<8xf32> to vector<8x1xf32>
    %26 = arith.addf %15, %25 : vector<8x1xf32>
    %27 = vector.extract_strided_slice %6 {offsets = [0, 2], sizes = [8, 1], strides = [1, 1]} : vector<8x11xi32> to vector<8x1xi32>
    %28 = vector.broadcast %27 : vector<8x1xi32> to vector<8x32xi32>
    %29 = arith.cmpi eq, %28, %7 : vector<8x32xi32>
    %cst_11 = arith.constant 1.000000e+00 : f32
    %cst_12 = arith.constant 0.000000e+00 : f32
    %30 = vector.broadcast %cst_11 : f32 to vector<8x32xf32>
    %31 = vector.broadcast %cst_12 : f32 to vector<8x32xf32>
    %32 = arith.select %29, %30, %31 : vector<8x32xi1>, vector<8x32xf32>
    %cst_13 = arith.constant dense<0.000000e+00> : vector<8x128xf32>
    %33 = tpu.matmul %32, %5, %cst_13 {dimension_numbers = #tpu.dot_dimension_numbers<[1], [0], [0], [1], [0, 0, 1, 1], [], []>} : vector<8x32xf32>, vector<32x128xf32>, vector<8x128xf32> -> vector<8x128xf32>
    %34 = arith.mulf %33, %14 : vector<8x128xf32>
    %cst_14 = arith.constant dense<0.000000e+00> : vector<8xf32>
    %35 = vector.multi_reduction <add>, %34, %cst_14 [1] : vector<8x128xf32> to vector<8xf32>
    %36 = vector.shape_cast %35 : vector<8xf32> to vector<8x1xf32>
    %37 = arith.addf %26, %36 : vector<8x1xf32>
    %38 = vector.extract_strided_slice %6 {offsets = [0, 3], sizes = [8, 1], strides = [1, 1]} : vector<8x11xi32> to vector<8x1xi32>
    %39 = vector.broadcast %38 : vector<8x1xi32> to vector<8x32xi32>
    %40 = arith.cmpi eq, %39, %7 : vector<8x32xi32>
    %cst_15 = arith.constant 1.000000e+00 : f32
    %cst_16 = arith.constant 0.000000e+00 : f32
    %41 = vector.broadcast %cst_15 : f32 to vector<8x32xf32>
    %42 = vector.broadcast %cst_16 : f32 to vector<8x32xf32>
    %43 = arith.select %40, %41, %42 : vector<8x32xi1>, vector<8x32xf32>
    %cst_17 = arith.constant dense<0.000000e+00> : vector<8x128xf32>
    %44 = tpu.matmul %43, %5, %cst_17 {dimension_numbers = #tpu.dot_dimension_numbers<[1], [0], [0], [1], [0, 0, 1, 1], [], []>} : vector<8x32xf32>, vector<32x128xf32>, vector<8x128xf32> -> vector<8x128xf32>
    %45 = arith.mulf %44, %14 : vector<8x128xf32>
    %cst_18 = arith.constant dense<0.000000e+00> : vector<8xf32>
    %46 = vector.multi_reduction <add>, %45, %cst_18 [1] : vector<8x128xf32> to vector<8xf32>
    %47 = vector.shape_cast %46 : vector<8xf32> to vector<8x1xf32>
    %48 = arith.addf %37, %47 : vector<8x1xf32>
    %49 = vector.extract_strided_slice %6 {offsets = [0, 4], sizes = [8, 1], strides = [1, 1]} : vector<8x11xi32> to vector<8x1xi32>
    %50 = vector.broadcast %49 : vector<8x1xi32> to vector<8x32xi32>
    %51 = arith.cmpi eq, %50, %7 : vector<8x32xi32>
    %cst_19 = arith.constant 1.000000e+00 : f32
    %cst_20 = arith.constant 0.000000e+00 : f32
    %52 = vector.broadcast %cst_19 : f32 to vector<8x32xf32>
    %53 = vector.broadcast %cst_20 : f32 to vector<8x32xf32>
    %54 = arith.select %51, %52, %53 : vector<8x32xi1>, vector<8x32xf32>
    %cst_21 = arith.constant dense<0.000000e+00> : vector<8x128xf32>
    %55 = tpu.matmul %54, %5, %cst_21 {dimension_numbers = #tpu.dot_dimension_numbers<[1], [0], [0], [1], [0, 0, 1, 1], [], []>} : vector<8x32xf32>, vector<32x128xf32>, vector<8x128xf32> -> vector<8x128xf32>
    %56 = arith.mulf %55, %14 : vector<8x128xf32>
    %cst_22 = arith.constant dense<0.000000e+00> : vector<8xf32>
    %57 = vector.multi_reduction <add>, %56, %cst_22 [1] : vector<8x128xf32> to vector<8xf32>
    %58 = vector.shape_cast %57 : vector<8xf32> to vector<8x1xf32>
    %59 = arith.addf %48, %58 : vector<8x1xf32>
    %60 = vector.extract_strided_slice %6 {offsets = [0, 5], sizes = [8, 1], strides = [1, 1]} : vector<8x11xi32> to vector<8x1xi32>
    %61 = vector.broadcast %60 : vector<8x1xi32> to vector<8x32xi32>
    %62 = arith.cmpi eq, %61, %7 : vector<8x32xi32>
    %cst_23 = arith.constant 1.000000e+00 : f32
    %cst_24 = arith.constant 0.000000e+00 : f32
    %63 = vector.broadcast %cst_23 : f32 to vector<8x32xf32>
    %64 = vector.broadcast %cst_24 : f32 to vector<8x32xf32>
    %65 = arith.select %62, %63, %64 : vector<8x32xi1>, vector<8x32xf32>
    %cst_25 = arith.constant dense<0.000000e+00> : vector<8x128xf32>
    %66 = tpu.matmul %65, %5, %cst_25 {dimension_numbers = #tpu.dot_dimension_numbers<[1], [0], [0], [1], [0, 0, 1, 1], [], []>} : vector<8x32xf32>, vector<32x128xf32>, vector<8x128xf32> -> vector<8x128xf32>
    %67 = arith.mulf %66, %14 : vector<8x128xf32>
    %cst_26 = arith.constant dense<0.000000e+00> : vector<8xf32>
    %68 = vector.multi_reduction <add>, %67, %cst_26 [1] : vector<8x128xf32> to vector<8xf32>
    %69 = vector.shape_cast %68 : vector<8xf32> to vector<8x1xf32>
    %70 = arith.addf %59, %69 : vector<8x1xf32>
    %71 = vector.extract_strided_slice %6 {offsets = [0, 6], sizes = [8, 1], strides = [1, 1]} : vector<8x11xi32> to vector<8x1xi32>
    %72 = vector.broadcast %71 : vector<8x1xi32> to vector<8x32xi32>
    %73 = arith.cmpi eq, %72, %7 : vector<8x32xi32>
    %cst_27 = arith.constant 1.000000e+00 : f32
    %cst_28 = arith.constant 0.000000e+00 : f32
    %74 = vector.broadcast %cst_27 : f32 to vector<8x32xf32>
    %75 = vector.broadcast %cst_28 : f32 to vector<8x32xf32>
    %76 = arith.select %73, %74, %75 : vector<8x32xi1>, vector<8x32xf32>
    %cst_29 = arith.constant dense<0.000000e+00> : vector<8x128xf32>
    %77 = tpu.matmul %76, %5, %cst_29 {dimension_numbers = #tpu.dot_dimension_numbers<[1], [0], [0], [1], [0, 0, 1, 1], [], []>} : vector<8x32xf32>, vector<32x128xf32>, vector<8x128xf32> -> vector<8x128xf32>
    %78 = arith.mulf %77, %14 : vector<8x128xf32>
    %cst_30 = arith.constant dense<0.000000e+00> : vector<8xf32>
    %79 = vector.multi_reduction <add>, %78, %cst_30 [1] : vector<8x128xf32> to vector<8xf32>
    %80 = vector.shape_cast %79 : vector<8xf32> to vector<8x1xf32>
    %81 = vector.extract_strided_slice %6 {offsets = [0, 7], sizes = [8, 1], strides = [1, 1]} : vector<8x11xi32> to vector<8x1xi32>
    %82 = vector.broadcast %81 : vector<8x1xi32> to vector<8x32xi32>
    %83 = arith.cmpi eq, %82, %7 : vector<8x32xi32>
    %cst_31 = arith.constant 1.000000e+00 : f32
    %cst_32 = arith.constant 0.000000e+00 : f32
    %84 = vector.broadcast %cst_31 : f32 to vector<8x32xf32>
    %85 = vector.broadcast %cst_32 : f32 to vector<8x32xf32>
    %86 = arith.select %83, %84, %85 : vector<8x32xi1>, vector<8x32xf32>
    %cst_33 = arith.constant dense<0.000000e+00> : vector<8x128xf32>
    %87 = tpu.matmul %86, %5, %cst_33 {dimension_numbers = #tpu.dot_dimension_numbers<[1], [0], [0], [1], [0, 0, 1, 1], [], []>} : vector<8x32xf32>, vector<32x128xf32>, vector<8x128xf32> -> vector<8x128xf32>
    %88 = arith.mulf %87, %14 : vector<8x128xf32>
    %cst_34 = arith.constant dense<0.000000e+00> : vector<8xf32>
    %89 = vector.multi_reduction <add>, %88, %cst_34 [1] : vector<8x128xf32> to vector<8xf32>
    %90 = vector.shape_cast %89 : vector<8xf32> to vector<8x1xf32>
    %91 = vector.extract_strided_slice %6 {offsets = [0, 8], sizes = [8, 1], strides = [1, 1]} : vector<8x11xi32> to vector<8x1xi32>
    %92 = vector.broadcast %91 : vector<8x1xi32> to vector<8x32xi32>
    %93 = arith.cmpi eq, %92, %7 : vector<8x32xi32>
    %cst_35 = arith.constant 1.000000e+00 : f32
    %cst_36 = arith.constant 0.000000e+00 : f32
    %94 = vector.broadcast %cst_35 : f32 to vector<8x32xf32>
    %95 = vector.broadcast %cst_36 : f32 to vector<8x32xf32>
    %96 = arith.select %93, %94, %95 : vector<8x32xi1>, vector<8x32xf32>
    %cst_37 = arith.constant dense<0.000000e+00> : vector<8x128xf32>
    %97 = tpu.matmul %96, %5, %cst_37 {dimension_numbers = #tpu.dot_dimension_numbers<[1], [0], [0], [1], [0, 0, 1, 1], [], []>} : vector<8x32xf32>, vector<32x128xf32>, vector<8x128xf32> -> vector<8x128xf32>
    %98 = arith.mulf %97, %14 : vector<8x128xf32>
    %cst_38 = arith.constant dense<0.000000e+00> : vector<8xf32>
    %99 = vector.multi_reduction <add>, %98, %cst_38 [1] : vector<8x128xf32> to vector<8xf32>
    %100 = vector.shape_cast %99 : vector<8xf32> to vector<8x1xf32>
    %101 = vector.extract_strided_slice %6 {offsets = [0, 9], sizes = [8, 1], strides = [1, 1]} : vector<8x11xi32> to vector<8x1xi32>
    %102 = vector.broadcast %101 : vector<8x1xi32> to vector<8x32xi32>
    %103 = arith.cmpi eq, %102, %7 : vector<8x32xi32>
    %cst_39 = arith.constant 1.000000e+00 : f32
    %cst_40 = arith.constant 0.000000e+00 : f32
    %104 = vector.broadcast %cst_39 : f32 to vector<8x32xf32>
    %105 = vector.broadcast %cst_40 : f32 to vector<8x32xf32>
    %106 = arith.select %103, %104, %105 : vector<8x32xi1>, vector<8x32xf32>
    %cst_41 = arith.constant dense<0.000000e+00> : vector<8x128xf32>
    %107 = tpu.matmul %106, %5, %cst_41 {dimension_numbers = #tpu.dot_dimension_numbers<[1], [0], [0], [1], [0, 0, 1, 1], [], []>} : vector<8x32xf32>, vector<32x128xf32>, vector<8x128xf32> -> vector<8x128xf32>
    %108 = arith.mulf %107, %14 : vector<8x128xf32>
    %cst_42 = arith.constant dense<0.000000e+00> : vector<8xf32>
    %109 = vector.multi_reduction <add>, %108, %cst_42 [1] : vector<8x128xf32> to vector<8xf32>
    %110 = vector.shape_cast %109 : vector<8xf32> to vector<8x1xf32>
    %111 = vector.extract_strided_slice %6 {offsets = [0, 10], sizes = [8, 1], strides = [1, 1]} : vector<8x11xi32> to vector<8x1xi32>
    %112 = vector.broadcast %111 : vector<8x1xi32> to vector<8x32xi32>
    %113 = arith.cmpi eq, %112, %7 : vector<8x32xi32>
    %cst_43 = arith.constant 1.000000e+00 : f32
    %cst_44 = arith.constant 0.000000e+00 : f32
    %114 = vector.broadcast %cst_43 : f32 to vector<8x32xf32>
    %115 = vector.broadcast %cst_44 : f32 to vector<8x32xf32>
    %116 = arith.select %113, %114, %115 : vector<8x32xi1>, vector<8x32xf32>
    %cst_45 = arith.constant dense<0.000000e+00> : vector<8x128xf32>
    %117 = tpu.matmul %116, %5, %cst_45 {dimension_numbers = #tpu.dot_dimension_numbers<[1], [0], [0], [1], [0, 0, 1, 1], [], []>} : vector<8x32xf32>, vector<32x128xf32>, vector<8x128xf32> -> vector<8x128xf32>
    %118 = arith.mulf %117, %14 : vector<8x128xf32>
    %cst_46 = arith.constant dense<0.000000e+00> : vector<8xf32>
    %119 = vector.multi_reduction <add>, %118, %cst_46 [1] : vector<8x128xf32> to vector<8xf32>
    %120 = vector.shape_cast %119 : vector<8xf32> to vector<8x1xf32>
    %121 = tpu.concatenate %25, %36, %47, %58, %69, %80, %90, %100, %110, %120 in 1 : vector<8x1xf32>, vector<8x1xf32>, vector<8x1xf32>, vector<8x1xf32>, vector<8x1xf32>, vector<8x1xf32>, vector<8x1xf32>, vector<8x1xf32>, vector<8x1xf32>, vector<8x1xf32> -> vector<8x10xf32>
    %122 = tpu.iota {dimensions = array<i32: 0>} : vector<8x1xi32>
    %123 = vector.broadcast %1 : i32 to vector<8x1xi32>
    %124 = arith.addi %123, %122 : vector<8x1xi32>
    %c20_i32 = arith.constant 20 : i32
    %125 = vector.broadcast %c20_i32 : i32 to vector<8x1xi32>
    %126 = arith.cmpi slt, %124, %125 : vector<8x1xi32>
    %cst_47 = arith.constant -1.000000e+30 : f32
    %127 = vector.shape_cast %126 : vector<8x1xi1> to vector<8x1xi1>
    %128 = vector.broadcast %127 : vector<8x1xi1> to vector<8x10xi1>
    %129 = vector.broadcast %cst_47 : f32 to vector<8x10xf32>
    %130 = arith.select %128, %121, %129 : vector<8x10xi1>, vector<8x10xf32>
    %c0_48 = arith.constant 0 : index
    %c0_49 = arith.constant 0 : index
    %131 = vector.load %arg6[%c0_48, %c0_49] : memref<1x10xf32, #tpu.memory_space<vmem>>, vector<1x10xf32>
    %cst_50 = arith.constant dense<0xFF800000> : vector<10xf32>
    %132 = vector.multi_reduction <maximumf>, %130, %cst_50 [0] : vector<8x10xf32> to vector<10xf32>
    %133 = vector.shape_cast %132 : vector<10xf32> to vector<1x10xf32>
    %134 = arith.maximumf %131, %133 : vector<1x10xf32>
    %135 = vector.broadcast %134 : vector<1x10xf32> to vector<8x10xf32>
    %136 = arith.subf %130, %135 : vector<8x10xf32>
    %137 = math.exp %136 : vector<8x10xf32>
    %cst_51 = arith.constant 0.000000e+00 : f32
    %138 = vector.shape_cast %126 : vector<8x1xi1> to vector<8x1xi1>
    %139 = vector.broadcast %138 : vector<8x1xi1> to vector<8x10xi1>
    %140 = vector.broadcast %cst_51 : f32 to vector<8x10xf32>
    %141 = arith.select %139, %137, %140 : vector<8x10xi1>, vector<8x10xf32>
    %c0_52 = arith.constant 0 : index
    %c0_53 = arith.constant 0 : index
    %142 = vector.load %arg7[%c0_52, %c0_53] : memref<1x10xf32, #tpu.memory_space<vmem>>, vector<1x10xf32>
    %143 = arith.subf %131, %134 : vector<1x10xf32>
    %144 = math.exp %143 : vector<1x10xf32>
    %145 = arith.mulf %142, %144 : vector<1x10xf32>
    %cst_54 = arith.constant dense<0.000000e+00> : vector<10xf32>
    %146 = vector.multi_reduction <add>, %141, %cst_54 [0] : vector<8x10xf32> to vector<10xf32>
    %147 = vector.shape_cast %146 : vector<10xf32> to vector<1x10xf32>
    %148 = arith.addf %145, %147 : vector<1x10xf32>
    %c0_55 = arith.constant 0 : index
    %c0_56 = arith.constant 0 : index
    %149 = vector.load %arg7[%c0_55, %c0_56] : memref<1x10xf32, #tpu.memory_space<vmem>>, vector<1x10xf32>
    tpu.vector_store %arg7[%c0_55, %c0_56], %148 {strides = array<i32>} : memref<1x10xf32, #tpu.memory_space<vmem>>, vector<1x10xf32>,
    %c0_57 = arith.constant 0 : index
    %c0_58 = arith.constant 0 : index
    %150 = vector.load %arg6[%c0_57, %c0_58] : memref<1x10xf32, #tpu.memory_space<vmem>>, vector<1x10xf32>
    tpu.vector_store %arg6[%c0_57, %c0_58], %134 {strides = array<i32>} : memref<1x10xf32, #tpu.memory_space<vmem>>, vector<1x10xf32>,
    %151 = arith.index_cast %1 : i32 to index
    %c0_59 = arith.constant 0 : index
    %152 = vector.load %arg3[%151, %c0_59] : memref<24x1xf32, #tpu.memory_space<vmem>>, vector<8x1xf32>
    tpu.vector_store %arg3[%151, %c0_59], %70 {strides = array<i32>} : memref<24x1xf32, #tpu.memory_space<vmem>>, vector<8x1xf32>,
    %c2_i32 = arith.constant 2 : i32
    %153 = arith.cmpi eq, %arg0, %c2_i32 : i32
    %154 = arith.extui %153 : i1 to i32
    %c0_i32_60 = arith.constant 0 : i32
    %155 = arith.cmpi ne, %154, %c0_i32_60 : i32
    scf.if %155 {
      %c0_61 = arith.constant 0 : index
      %c0_62 = arith.constant 0 : index
      %156 = vector.load %arg6[%c0_61, %c0_62] : memref<1x10xf32, #tpu.memory_space<vmem>>, vector<1x5xf32>
      %c0_63 = arith.constant 0 : index
      %c0_64 = arith.constant 0 : index
      %157 = vector.load %arg7[%c0_63, %c0_64] : memref<1x10xf32, #tpu.memory_space<vmem>>, vector<1x5xf32>
      %158 = math.log %157 : vector<1x5xf32>
      %159 = arith.addf %156, %158 : vector<1x5xf32>
      %160 = vector.shape_cast %159 : vector<1x5xf32> to vector<1x1x5xf32>
      %cst_65 = arith.constant dense<0.000000e+00> : vector<1xf32>
      %161 = vector.multi_reduction <add>, %160, %cst_65 [1, 2] : vector<1x1x5xf32> to vector<1xf32>
      %162 = vector.shape_cast %161 : vector<1xf32> to vector<1x1x1xf32>
      %163 = vector.extract %162[0, 0, 0] : f32 from vector<1x1x1xf32>
      %c0_66 = arith.constant 0 : index
      %c0_67 = arith.constant 0 : index
      %164 = vector.load %arg3[%c0_66, %c0_67] : memref<24x1xf32, #tpu.memory_space<vmem>>, vector<24x1xf32>
      %165 = vector.broadcast %163 : f32 to vector<24x1xf32>
      %166 = arith.subf %165, %164 : vector<24x1xf32>
      %c0_68 = arith.constant 0 : index
      %c0_69 = arith.constant 0 : index
      %167 = vector.load %arg3[%c0_68, %c0_69] : memref<24x1xf32, #tpu.memory_space<vmem>>, vector<24x1xf32>
      tpu.vector_store %arg3[%c0_68, %c0_69], %166 {strides = array<i32>} : memref<24x1xf32, #tpu.memory_space<vmem>>, vector<24x1xf32>,
    } else {
    }
    return
  }
  func.func @transform_0(%arg0: i32) -> (i32, i32) {
    %c0_i32 = arith.constant 0 : i32
    %c0_i32_0 = arith.constant 0 : i32
    return %arg0, %c0_i32 : i32, i32
  }
  func.func @transform_2(%arg0: i32) -> (i32, i32) {
    %c0_i32 = arith.constant 0 : i32
    %c0_i32_0 = arith.constant 0 : i32
    %c0_i32_1 = arith.constant 0 : i32
    return %c0_i32, %c0_i32_0 : i32, i32
  }
}

</mosaic_0001>

<bundles_post_ra>
// kernel: tpu_custom_call.1
= control target key start
LH: loop header
LB: loop body
LE: loop exit
PB: predicated region body
PF: predicated region fallthrough
CT: control target
= control target key end

     0   :  { %s1547_s9 = smov 0   ;;  %s1723_s0 = inlined_call_operand.vmem [shape: s32[24,11], index: 0, kind: input, shape index: {}]   ;;  %s1724_s1 = inlined_call_operand.vmem [shape: f32[32,128], index: 1, kind: input, shape index: {}]   ;;  %s1725_s2 = inlined_call_operand.vmem [shape: f32[24,1], index: 2, kind: output, shape index: {}]  }
   0x1 LB: > { %s1553_s10 = sadd.s32 4294967295, %s1514_s9   ;;  %p1201_p0 = scmp.ge.s32.totalorder %s1514_s9, 1  ;;  %s1514_s9 = sphi %s1547_s9, %s12_s9  }
   0x2   : > { %p82_p1 = scmp.lt.s32.totalorder %s1514_s9, 4 }
   0x4   : > { %p83_p2 = pnand %p1201_p0, %p82_p1 }
   0x5   : > { %p96_p3 = scmp.lt.s32.totalorder (!%p83_p2), %s1553_s10, 2  ;;  %s1203_s11 = sshll.u32 (!%p83_p2), %s1553_s10, 3 }
   0x6   : > { %86 = sbr.rel (%p83_p2) target bundleno = 836 (0x344), region = 24  ;;  %p1204_p4 = scmp.ne.s32.totalorder (!%p83_p2), %s1553_s10, 0 }
   0xd   : > { %s97_s12 = scalar_select %p96_p3, %s1553_s10, 2 }
   0xe   : > { %104 = sbr.rel (%p1204_p4) target bundleno = 25 (0x19), region = 28  ;;  %v137_v0 = vld [vmem:[%s1724_s1] sm:$0xff] (!%p1204_p4)  ;;  %v139_v1 = vld [vmem:[%s1724_s1 + $0x8] sm:$0xff] (!%p1204_p4)  ;;  %v141_v2 = vld [vmem:[%s1724_s1 + $0x10] sm:$0xff] (!%p1204_p4) }
   0xf   : > { %s1202_s13 = sshll.u32 %s97_s12, 3  ;;  %138 = vst [vmem:[#allocation2] sm:$0xff] (!%p1204_p4), %v137_v0  ;;  %140 = vst [vmem:[#allocation2 + $0x8] sm:$0xff] (!%p1204_p4), %v139_v1  ;;  %v143_v3 = vld [vmem:[%s1724_s1 + $0x18] sm:$0xff] (!%p1204_p4) }
  0x10   : > { %s99_s16 = scalar_lea.vmem %s1723_s0, %s1202_s13  ;;  %142 = vst [vmem:[#allocation2 + $0x10] sm:$0xff] (!%p1204_p4), %v141_v2  ;;  %144 = vst [vmem:[#allocation2 + $0x18] sm:$0xff] (!%p1204_p4), %v143_v3 }
  0x15   : > { %152 = vsyncadd [#allocation3], 512 }
  0x16   : > { %1510 = dma.done.wait [#allocation3], 512 }
  0x17   : > { %1511 = vsyncadd [#allocation3], 4294966784  ;;  %vm156_vm0 = vcmask 73728   ;;  %v1516_v4 = vmov -1e+30   ;;  %v1517_v5 = vmov 0.0  }
  0x18   : > { %157 = vst.msk [vmem:[#allocation4] sm:$0x1] %vm156_vm0, %v1516_v4  ;;  %158 = vst.msk [vmem:[#allocation5] sm:$0x1] %vm156_vm0, %v1517_v5 }
  0x19 PF: > { %v163_v6 = vld [vmem:[%s99_s16] sm:$0xff]  ;;  %v1518_v8 = vmov 0   ;;  %v1519_v9 = vmov 2   ;;  %v1520_v13 = vmov 0.0|0.0   ;;  %v1521_v16 = vmov 1   ;;  %s1122_s27 = scalar_lea.vmem %s1725_s2, %s1203_s11  ;;  %p1216_p5 = scmp.ne.s32.totalorder %s1553_s10, 2 }
  0x1a   : > { %v159_v7 = vld [vmem:[#allocation2] sm:$0xff]  ;;  %1488 = vset.pattern.permute.xlu0 %v1518_v8  ;;  %1490 = vset.pattern.permute.xlu1 %v1519_v9  ;;  %v160_v10 = vld [vmem:[#allocation2 + $0x8] sm:$0xff]  ;;  %v1522_v17 = vmov 3   ;;  %vm1523_vm1 = vmmov 0   ;;  %v1524_v18 = vmov 0.0   ;;  %v1525_v19 = vmov 4  }
  0x1b   : > { %167 = vperm.xlu0 %1488, %v163_v6   ;;  %328 = vperm.xlu1 %1490, %v163_v6   ;;  %v161_v11 = vld [vmem:[#allocation2 + $0x10] sm:$0xff]  ;;  %v162_v12 = vld [vmem:[#allocation2 + $0x18] sm:$0xff]  ;;  %v1577_v14 = vpack.c.bf16 %v160_v10, %v159_v7  ;;  %v1526_v20 = vmov 5   ;;  %v1527_v21 = vmov 6   ;;  %v1528_v22 = vmov 8  }
  0x1c   : > { %1396 = vmatprep.subr.bf16.mxu0 %v1520_v13  ;;  %1402 = vmatprep.subr.bf16.mxu1 %v1520_v13  ;;  %v1581_v15 = vpack.c.bf16 %v162_v12, %v161_v11  ;;  %v1529_v23 = vmov 7   ;;  %v1530_v24 = vmov 10   ;;  %v1531_v25 = vmov 9  }
  0x1d   : > { %1398 = vmatpush3.bf16.msra.mxu0 %v1577_v14  ;;  %1404 = vmatpush3.bf16.msra.mxu1 %v1577_v14  ;;  %v164_v26 = vlaneseq  ;;  %vm171_vm2 = vcmask 261120   ;;  %vm1060_vm14 = vcmask 7168   ;;  %vm1062_vm15 = vcmask 15360  }
  0x1e   : > { %1399 = vmatprep.subr.bf16.mxu0 %v1520_v13  ;;  %1283 = vmatprep.mubr.msk.f32.mxu0 %vm1523_vm1, %v1524_v18  ;;  %vm1064_vm0 = vcmask 23552  }
  0x1f   : > { %1489 = vset.pattern.permute.xlu0 %v1521_v16  ;;  %1491 = vset.pattern.permute.xlu1 %v1522_v17  ;;  %v1595_v27 = vand.u32 127, %v164_v26 }
  0x20   : > { %246 = vperm.xlu0 %1489, %v163_v6   ;;  %410 = vperm.xlu1 %1491, %v163_v6  }
  0x21   : > { %1401 = vmatpush3.bf16.msra.mxu0 %v1581_v15  ;;  %1405 = vmatprep.subr.bf16.mxu1 %v1520_v13 }
  0x22   : > { %1408 = vmatprep.subr.bf16.mxu0 %v1520_v13  ;;  %1407 = vmatpush3.bf16.msra.mxu1 %v1581_v15 }
  0x23   : > { %1294 = vmatprep.mubr.msk.f32.mxu1 %vm1523_vm1, %v1524_v18  ;;  %1414 = vmatprep.subr.bf16.mxu1 %v1520_v13 }
  0x24   : > { %1492 = vset.pattern.permute.xlu1 %v1525_v19  ;;  %1493 = vset.pattern.permute.xlu0 %v1526_v20 }
  0x25   : > { %492 = vperm.xlu1 %1492, %v163_v6   ;;  %574 = vperm.xlu0 %1493, %v163_v6  }
  0x29   : > { %1494 = vset.pattern.permute.xlu1 %v1527_v21  ;;  %1496 = vset.pattern.permute.xlu0 %v1528_v22 }
  0x2a   : > { %656 = vperm.xlu1 %1494, %v163_v6   ;;  %818 = vperm.xlu0 %1496, %v163_v6  }
  0x2e   : > { %1495 = vset.pattern.permute.xlu1 %v1529_v23  ;;  %1499 = vset.pattern.permute.xlu0 %v1530_v24 }
  0x2f   : > { %737 = vperm.xlu1 %1495, %v163_v6  }
  0x33   : > { %1497 = vset.pattern.permute.xlu1 %v1531_v25 }
  0x34   : > { %899 = vperm.xlu1 %1497, %v163_v6  }
  0x38   : > { %1498 = vset.pattern.permute.xlu1 %v1530_v24 }
  0x39   : > { %980 = vperm.xlu1 %1498, %v163_v6  }
  0x9a   : > { %v168_v28 = vpop.permute.xlu0 %167  ;;  %v329_v29 = vpop.permute.xlu1 %328 }
  0x9b   : > { %vm169_vm3 = vcmp.eq.s32.totalorder %v168_v28, %v1595_v27  ;;  %vm330_vm4 = vcmp.eq.s32.totalorder %v329_v29, %v1595_v27  ;;  %v1079_v28 = vshrl.u32 %v164_v26, 7 }
  0x9c   : > { %v170_v30 = vsel %vm169_vm3, 1.0, %v1524_v18  ;;  %v331_v34 = vsel %vm330_vm4, 1.0, %v1524_v18  ;;  %vm1070_vm3 = vcmask 48128   ;;  %vm1072_vm4 = vcmask 56320  }
  0x9d   : > { %1284 = vmatmul.mubr.msk.f32.vlgmr.msra.gmra.mrb[0].mxu0 %vm171_vm2, %v170_v30  ;;  %v1080_v30 = vstv %s1203_s11 }
  0x9e   : > { %1410 = vmatpush3.bf16.msra.mxu0 %v1577_v14  ;;  %1305 = vmatprep.mubr.msk.f32.mxu0 %vm1523_vm1, %v1524_v18 }
  0x9f   : > { %v247_v31 = vpop.permute.xlu0 %246  ;;  %1411 = vmatprep.subr.bf16.mxu0 %v1520_v13  ;;  %v411_v32 = vpop.permute.xlu1 %410 }
  0xa0   : > { %vm248_vm5 = vcmp.eq.s32.totalorder %v247_v31, %v1595_v27  ;;  %vm412_vm6 = vcmp.eq.s32.totalorder %v411_v32, %v1595_v27 }
  0xa1   : > { %v249_v33 = vsel %vm248_vm5, 1.0, %v1524_v18  ;;  %v413_v36 = vsel %vm412_vm6, 1.0, %v1524_v18  ;;  %vm1074_vm5 = vcmask 64512   ;;  %vm1076_vm6 = vcmask 72704  }
  0xa2   : > { %1413 = vmatpush3.bf16.msra.mxu0 %v1581_v15  ;;  %1295 = vmatmul.mubr.msk.f32.vlgmr.msra.gmra.mrb[0].mxu1 %vm171_vm2, %v249_v33 }
  0xa3   : > { %1416 = vmatpush3.bf16.msra.mxu1 %v1577_v14  ;;  %1420 = vmatprep.subr.bf16.mxu0 %v1520_v13 }
  0xa4   : > { %1417 = vmatprep.subr.bf16.mxu1 %v1520_v13  ;;  %1316 = vmatprep.mubr.msk.f32.mxu1 %vm1523_vm1, %v1524_v18  ;;  %v493_v35 = vpop.permute.xlu1 %492  ;;  %v575_v37 = vpop.permute.xlu0 %574 }
  0xa5   : > { %1306 = vmatmul.mubr.msk.f32.vlgmr.msra.gmra.mrb[2].mxu0 %vm171_vm2, %v331_v34  ;;  %vm494_vm7 = vcmp.eq.s32.totalorder %v493_v35, %v1595_v27  ;;  %vm576_vm8 = vcmp.eq.s32.totalorder %v575_v37, %v1595_v27  ;;  %v1081_v35 = vadd.s32 %v1080_v30, %v1079_v28 }
  0xa6   : > { %1422 = vmatpush3.bf16.msra.mxu0 %v1577_v14  ;;  %1327 = vmatprep.mubr.msk.f32.mxu0 %vm1523_vm1, %v1524_v18  ;;  %v495_v38 = vsel %vm494_vm7, 1.0, %v1524_v18  ;;  %v577_v40 = vsel %vm576_vm8, 1.0, %v1524_v18  ;;  %vm1087_vm8 = vcmask 80896  }
  0xa7   : > { %1419 = vmatpush3.bf16.msra.mxu1 %v1581_v15  ;;  %1423 = vmatprep.subr.bf16.mxu0 %v1520_v13  ;;  %vm1082_vm7 = vcmp.lt.s32.totalorder %v1081_v35, 20 }
  0xa8   : > { %1426 = vmatprep.subr.bf16.mxu1 %v1520_v13 }
  0xa9   : > { %v657_v39 = vpop.permute.xlu1 %656  ;;  %v819_v43 = vpop.permute.xlu0 %818 }
  0xaa   : > { %1317 = vmatmul.mubr.msk.f32.vlgmr.msra.gmra.mrb[2].mxu1 %vm171_vm2, %v413_v36  ;;  %1425 = vmatpush3.bf16.msra.mxu0 %v1581_v15  ;;  %vm658_vm9 = vcmp.eq.s32.totalorder %v657_v39, %v1595_v27  ;;  %vm820_vm11 = vcmp.eq.s32.totalorder %v819_v43, %v1595_v27 }
  0xab   : > { %1428 = vmatpush3.bf16.msra.mxu1 %v1577_v14  ;;  %1432 = vmatprep.subr.bf16.mxu0 %v1520_v13  ;;  %v659_v42 = vsel %vm658_vm9, 1.0, %v1524_v18  ;;  %v821_v46 = vsel %vm820_vm11, 1.0, %v1524_v18  ;;  %vm1119_vm9 = vcmask 73728  }
  0xac   : > { %1429 = vmatprep.subr.bf16.mxu1 %v1520_v13  ;;  %1338 = vmatprep.mubr.msk.f32.mxu1 %vm1523_vm1, %v1524_v18 }
  0xad   : > { %1328 = vmatmul.mubr.msk.f32.vlgmr.msra.gmra.mrb[4].mxu0 %vm171_vm2, %v495_v38 }
  0xae   : > { %1434 = vmatpush3.bf16.msra.mxu0 %v1577_v14  ;;  %1349 = vmatprep.mubr.msk.f32.mxu0 %vm1523_vm1, %v1524_v18  ;;  %v738_v41 = vpop.permute.xlu1 %737 }
  0xaf   : > { %1431 = vmatpush3.bf16.msra.mxu1 %v1581_v15  ;;  %1435 = vmatprep.subr.bf16.mxu0 %v1520_v13  ;;  %vm739_vm10 = vcmp.eq.s32.totalorder %v738_v41, %v1595_v27 }
  0xb0   : > { %1438 = vmatprep.subr.bf16.mxu1 %v1520_v13  ;;  %v740_v45 = vsel %vm739_vm10, 1.0, %v1524_v18  ;;  %vm1133_vm10 = vcmask (!%p1216_p5), 32768  }
  0xb2   : > { %1339 = vmatmul.mubr.msk.f32.vlgmr.msra.gmra.mrb[4].mxu1 %vm171_vm2, %v577_v40  ;;  %1437 = vmatpush3.bf16.msra.mxu0 %v1581_v15 }
  0xb3   : > { %1440 = vmatpush3.bf16.msra.mxu1 %v1577_v14  ;;  %1444 = vmatprep.subr.bf16.mxu0 %v1520_v13  ;;  %v900_v44 = vpop.permute.xlu1 %899 }
  0xb4   : > { %1441 = vmatprep.subr.bf16.mxu1 %v1520_v13  ;;  %1360 = vmatprep.mubr.msk.f32.mxu1 %vm1523_vm1, %v1524_v18  ;;  %vm901_vm12 = vcmp.eq.s32.totalorder %v900_v44, %v1595_v27 }
  0xb5   : > { %1350 = vmatmul.mubr.msk.f32.vlgmr.msra.gmra.mrb[6].mxu0 %vm171_vm2, %v659_v42  ;;  %v902_v48 = vsel %vm901_vm12, 1.0, %v1524_v18 }
  0xb6   : > { %1446 = vmatpush3.bf16.msra.mxu0 %v1577_v14  ;;  %1371 = vmatprep.mubr.msk.f32.mxu0 %vm1523_vm1, %v1524_v18 }
  0xb7   : > { %1443 = vmatpush3.bf16.msra.mxu1 %v1581_v15  ;;  %1447 = vmatprep.subr.bf16.mxu0 %v1520_v13 }
  0xb8   : > { %1450 = vmatprep.subr.bf16.mxu1 %v1520_v13  ;;  %v981_v47 = vpop.permute.xlu1 %980 }
  0xb9   : > { %vm982_vm13 = vcmp.eq.s32.totalorder %v981_v47, %v1595_v27 }
  0xba   : > { %1361 = vmatmul.mubr.msk.f32.vlgmr.msra.gmra.mrb[6].mxu1 %vm171_vm2, %v740_v45  ;;  %1449 = vmatpush3.bf16.msra.mxu0 %v1581_v15  ;;  %v983_v49 = vsel %vm982_vm13, 1.0, %v1524_v18 }
  0xbb   : > { %1452 = vmatpush3.bf16.msra.mxu1 %v1577_v14  ;;  %1456 = vmatprep.subr.bf16.mxu0 %v1520_v13 }
  0xbc   : > { %1453 = vmatprep.subr.bf16.mxu1 %v1520_v13  ;;  %1382 = vmatprep.mubr.msk.f32.mxu1 %vm1523_vm1, %v1524_v18 }
  0xbd   : > { %1372 = vmatmul.mubr.msk.f32.vlgmr.msra.gmra.mrb[8].mxu0 %vm171_vm2, %v821_v46 }
  0xbe   : > { %1458 = vmatpush3.bf16.msra.mxu0 %v1577_v14  ;;  %1393 = vmatprep.mubr.msk.f32.mxu0 %vm1523_vm1, %v1524_v18  ;;  %vm1066_vm1 = vcmask 31744  }
  0xbf   : > { %1455 = vmatpush3.bf16.msra.mxu1 %v1581_v15  ;;  %1459 = vmatprep.subr.bf16.mxu0 %v1520_v13 }
  0xc2   : > { %1383 = vmatmul.mubr.msk.f32.vlgmr.msra.gmra.mrb[8].mxu1 %vm171_vm2, %v902_v48  ;;  %1461 = vmatpush3.bf16.msra.mxu0 %v1581_v15 }
  0xc5   : > { %1394 = vmatmul.mubr.msk.f32.vlgmr.msra.gmra.mrb[10].mxu0 %vm171_vm2, %v983_v49  ;;  %vm1068_vm2 = vcmask 39936  }
 0x170   : > { %v241_v50 = vpop.f32.mrb[0].mxu0 }
 0x171   : > { %v1285_v51 = vpop.f32.mrb[1].mxu0 }
 0x172   : > { %v1086_v51 = vld [vmem:[#allocation4] sm:$0x1] }
 0x175   : > { %v319_v52 = vpop.f32.mrb[0].mxu1 }
 0x176   : > { %v323_v53 = vmul.f32 %v319_v52, %v241_v50  ;;  %v1296_v54 = vpop.f32.mrb[1].mxu1  ;;  %v1099_v52 = vsub.s32 0, %v1079_v28 }
 0x178   : > { %v401_v55 = vpop.f32.mrb[2].mxu0  ;;  %324 = vadd.xlane.f32.xlu0 %v323_v53 }
 0x179   : > { %v405_v56 = vmul.f32 %v401_v55, %v241_v50  ;;  %v1307_v57 = vpop.f32.mrb[3].mxu0 }
 0x17b   : > { %406 = vadd.xlane.f32.xlu1 %v405_v56 }
 0x17d   : > { %v483_v58 = vpop.f32.mrb[2].mxu1 }
 0x17e   : > { %v487_v59 = vmul.f32 %v483_v58, %v241_v50  ;;  %v1318_v60 = vpop.f32.mrb[3].mxu1 }
 0x180   : > { %488 = vadd.xlane.f32.xlu0 %v487_v59  ;;  %v565_v61 = vpop.f32.mrb[4].mxu0 }
 0x181   : > { %v569_v62 = vmul.f32 %v565_v61, %v241_v50  ;;  %v1329_v63 = vpop.f32.mrb[5].mxu0 }
 0x184   : > { %570 = vadd.xlane.f32.xlu0 %v569_v62 }
 0x185   : > { %v647_v0 = vpop.f32.mrb[4].mxu1 }
 0x186   : > { %v651_v1 = vmul.f32 %v647_v0, %v241_v50  ;;  %v1340_v2 = vpop.f32.mrb[5].mxu1 }
 0x188   : > { %652 = vadd.xlane.f32.xlu1 %v651_v1  ;;  %v729_v3 = vpop.f32.mrb[6].mxu0 }
 0x189   : > { %v733_v4 = vmul.f32 %v729_v3, %v241_v50  ;;  %v1351_v5 = vpop.f32.mrb[7].mxu0 }
 0x18b   : > { %734 = vadd.xlane.f32.xlu0 %v733_v4  ;;  %v1106_v4 = vld [vmem:[#allocation5] sm:$0x1] }
 0x18d   : > { %v810_v6 = vpop.f32.mrb[6].mxu1 }
 0x18e   : > { %v814_v7 = vmul.f32 %v810_v6, %v241_v50  ;;  %v1362_v8 = vpop.f32.mrb[7].mxu1 }
 0x190   : > { %815 = vadd.xlane.f32.xlu1 %v814_v7  ;;  %v891_v9 = vpop.f32.mrb[8].mxu0 }
 0x191   : > { %v895_v10 = vmul.f32 %v891_v9, %v241_v50  ;;  %v1373_v11 = vpop.f32.mrb[9].mxu0 }
 0x193   : > { %896 = vadd.xlane.f32.xlu0 %v895_v10 }
 0x195   : > { %v972_v12 = vpop.f32.mrb[8].mxu1 }
 0x196   : > { %v976_v13 = vmul.f32 %v972_v12, %v241_v50  ;;  %v1384_v14 = vpop.f32.mrb[9].mxu1 }
 0x198   : > { %977 = vadd.xlane.f32.xlu1 %v976_v13  ;;  %v1053_v15 = vpop.f32.mrb[10].mxu0 }
 0x199   : > { %v1057_v16 = vmul.f32 %v1053_v15, %v241_v50  ;;  %v1395_v17 = vpop.f32.mrb[11].mxu0 }
 0x19b   : > { %1058 = vadd.xlane.f32.xlu0 %v1057_v16 }
 0x205   : > { %v325_v18 = vpop.xlane.xlu0 %324 }
 0x208   : > { %v407_v19 = vpop.xlane.xlu1 %406 }
 0x209   : > { %v408_v21 = vadd.f32 %v407_v19, %v325_v18  ;;  %v1061_v31 = vsel %vm1060_vm14, %v325_v18, %v407_v19 }
 0x20d   : > { %v489_v20 = vpop.xlane.xlu0 %488 }
 0x20e   : > { %v490_v23 = vadd.f32 %v489_v20, %v408_v21  ;;  %v1063_v33 = vsel %vm1062_vm15, %v1061_v31, %v489_v20 }
 0x211   : > { %v571_v22 = vpop.xlane.xlu0 %570 }
 0x212   : > { %v572_v24 = vadd.f32 %v571_v22, %v490_v23  ;;  %v1065_v34 = vsel %vm1064_vm0, %v1063_v33, %v571_v22 }
 0x215   : > { %v653_v25 = vpop.xlane.xlu1 %652 }
 0x216   : > { %v654_v27 = vadd.f32 %v653_v25, %v572_v24  ;;  %v1067_v36 = vsel %vm1066_vm1, %v1065_v34, %v653_v25 }
 0x218   : > { %1123 = vst.msk [vmem:[%s1122_s27] sm:$0xff] %vm1060_vm14, %v654_v27  ;;  %v735_v29 = vpop.xlane.xlu0 %734 }
 0x219   : > { %v1069_v38 = vsel %vm1068_vm2, %v1067_v36, %v735_v29 }
 0x21d   : > { %v816_v32 = vpop.xlane.xlu1 %815 }
 0x21e   : > { %v1071_v26 = vsel %vm1070_vm3, %v1069_v38, %v816_v32 }
 0x21f   : > { %v1144_v22 = vld [vmem:[%s1725_s2] sm:$0xff] (!%p1216_p5)  ;;  %v1145_v23 = vld [vmem:[%s1725_s2 + $0x8] sm:$0xff] (!%p1216_p5)  ;;  %v1146_v24 = vld [vmem:[%s1725_s2 + $0x10] sm:$0xff] (!%p1216_p5) }
 0x220   : > { %v897_v37 = vpop.xlane.xlu0 %896 }
 0x221   : > { %v1073_v40 = vsel %vm1072_vm4, %v1071_v26, %v897_v37 }
 0x225   : > { %v978_v39 = vpop.xlane.xlu1 %977 }
 0x226   : > { %v1075_v41 = vsel %vm1074_vm5, %v1073_v40, %v978_v39 }
 0x228   : > { %v1059_v42 = vpop.xlane.xlu0 %1058 }
 0x229   : > { %v1077_v43 = vsel %vm1076_vm6, %v1075_v41, %v1059_v42 }
 0x22a   : > { %v1085_v44 = vsel %vm1082_vm7, %v1077_v43, -1e+30 }
 0x22b   : > { %v1088_v45 = vsel %vm1087_vm8, %v1085_v44, -inf }
 0x22c   : > { %v1089_v46 = vrot.slane %v1088_v45, 4 }
 0x22e   : > { %v1090_v47 = vmax.f32 %v1088_v45, %v1089_v46 }
 0x230   : > { %v1091_v48 = vrot.slane %v1090_v47, 2 }
 0x232   : > { %v1092_v49 = vmax.f32 %v1090_v47, %v1091_v48 }
 0x234   : > { %v1093_v50 = vrot.slane %v1092_v49, 1 }
 0x236   : > { %v1094_v53 = vmax.f32 %v1092_v49, %v1093_v50 }
 0x238   : > { %v1095_v54 = vmax.f32 %v1086_v51, %v1094_v53 }
 0x23a   : > { %v1100_v55 = vrot.slane %v1095_v54, %v1099_v52  ;;  %1121 = vst.msk [vmem:[#allocation4] sm:$0x1] %vm1119_vm9, %v1095_v54  ;;  %v1107_v58 = vsub.f32 %v1086_v51, %v1095_v54 }
 0x23c   : > { %v1102_v56 = vsub.f32 %v1085_v44, %v1100_v55  ;;  %v1108_v59 = vmul.f32 1.442695, %v1107_v58 }
 0x23e   : > { %v1103_v57 = vmul.f32 1.442695, %v1102_v56 }
 0x240   : > { %1500 = vpow2.f32 %v1103_v57 }
 0x241   : > { %1502 = vpow2.f32 %v1108_v59  ;;  %v1128_v11 = vld [vmem:[#allocation4] sm:$0x1] (!%p1216_p5) }
 0x24a   : > { %v1501_v60 = vpop.eup %1500 }
 0x24b   : > { %v1105_v61 = vsel %vm1082_vm7, %v1501_v60, 0.0  ;;  %v1503_v3 = vpop.eup %1502 }
 0x24c   : > { %v1111_v62 = vsel %vm1087_vm8, %v1105_v61, 0.0  ;;  %v1110_v6 = vmul.f32 %v1503_v3, %v1106_v4 }
 0x24d   : > { %v1112_v63 = vrot.slane %v1111_v62, 4 }
 0x24f   : > { %v1113_v0 = vadd.f32 %v1112_v63, %v1111_v62 }
 0x251   : > { %v1114_v1 = vrot.slane %v1113_v0, 2 }
 0x253   : > { %v1115_v2 = vadd.f32 %v1114_v1, %v1113_v0 }
 0x255   : > { %v1116_v5 = vrot.slane %v1115_v2, 1  ;;  %1127 = sbr.rel (%p1216_p5) target bundleno = 836 (0x344), region = 66 }
 0x257   : > { %v1117_v7 = vadd.f32 %v1116_v5, %v1115_v2 }
 0x259   : > { %v1118_v8 = vadd.f32 %v1117_v7, %v1110_v6 }
 0x25b   : > { %1120 = vst.msk [vmem:[#allocation5] sm:$0x1] %vm1119_vm9, %v1118_v8 }
 0x262   : > { %v1129_v9 = vld [vmem:[#allocation5] sm:$0x1] }
 0x263   : > { %1504 = vlog2.f32 %v1129_v9 }
 0x26d   : > { %v1505_v10 = vpop.eup %1504 }
 0x26e   : > { %v1131_v12 = vmul.f32 0.6931472, %v1505_v10 }
 0x270   : > { %v1132_v13 = vadd.f32 %v1131_v12, %v1128_v11 }
 0x272   : > { %v1134_v14 = vsel %vm1133_vm10, %v1132_v13, 0.0 }
 0x273   : > { %1135 = vadd.xlane.f32.xlu0 %v1134_v14 }
 0x300   : > { %v1136_v15 = vpop.xlane.xlu0 %1135 }
 0x301   : > { %v1137_v16 = vrot.slane %v1136_v15, 4 }
 0x303   : > { %v1138_v17 = vadd.f32 %v1137_v16, %v1136_v15 }
 0x305   : > { %v1139_v18 = vrot.slane %v1138_v17, 2 }
 0x307   : > { %v1140_v19 = vadd.f32 %v1139_v18, %v1138_v17 }
 0x309   : > { %v1141_v20 = vrot.slane %v1140_v19, 1 }
 0x30b   : > { %v1142_v21 = vadd.f32 %v1141_v20, %v1140_v19 }
 0x30d   : > { %1462 = vpush %v1142_v21 }
 0x33e   : > { %s1463_s6 = spop %1462 }
 0x33f   : > { %v1147_v25 = vstv %s1463_s6 }
 0x340   : > { %v1148_v27 = vsub.f32 %v1147_v25, %v1144_v22  ;;  %v1149_v28 = vsub.f32 %v1147_v25, %v1145_v23  ;;  %v1150_v29 = vsub.f32 %v1147_v25, %v1146_v24 }
 0x342   : > { %1151 = vst.msk [vmem:[%s1725_s2] sm:$0xff] %vm1060_vm14, %v1148_v27  ;;  %1152 = vst.msk [vmem:[%s1725_s2 + $0x8] sm:$0xff] %vm1060_vm14, %v1149_v28 }
 0x343   : > { %1153 = vst.msk [vmem:[%s1725_s2 + $0x10] sm:$0xff] %vm1060_vm14, %v1150_v29 }
 0x344 PF: > { %s12_s9 = sadd.s32 1, %s1514_s9  }
 0x345   : > { %p9_p6 = scmp.ge.s32.totalorder %s12_s9, 5  }
 0x347   :  { %11 = sbr.rel (!%p9_p6) target bundleno = 1 (0x1), region = 101 }
 0x34e   :  { %1165 = vsyncmov [#allocation3] }
 0x351   :  { %s1166_s14 = vpop.sfrf %1165 }
 0x352   :  { %p1219_p7 = scmp.ne.s32.totalorder %s1166_s14, 0 }
 0x354   :  { %1170 = shalt.err (%p1219_p7)  }

</bundles_post_ra>
